<compile_context>
chip_gen: v5e
topology: v5e:2x2
jax: 0.10.0
libtpu: 0.0.40
codegen_flags: <defaults>
</compile_context>

<pallas_src>
import functools

import jax
import jax.numpy as jnp
from jax.experimental import pallas as pl
from jax.experimental.pallas import tpu as pltpu


def _layer_norm(v, gamma, beta, eps=1e-5):
    mu = jnp.mean(v, axis=-1, keepdims=True)
    var = jnp.mean((v - mu) ** 2, axis=-1, keepdims=True)
    return (v - mu) * jax.lax.rsqrt(var + eps) * gamma + beta


def _gelu_exact(v):
    # PyTorch nn.GELU() default = exact erf-based GELU (f32 for parity).
    return 0.5 * v * (1.0 + jax.lax.erf(v * 0.7071067811865476))


def transformer_block_kernel(
    x_ref,
    ln1g_ref, ln1b_ref,
    wqkv_ref, bqkv_ref,
    wo_ref, bo_ref,
    ln2g_ref, ln2b_ref,
    w1_ref, b1_ref, w2_ref, b2_ref,
    o_ref,
    qkv_ref, ctx_ref,
    *, num_heads, seq_len, samples_per_tile,
):
    f32 = jnp.float32
    bf16 = jnp.bfloat16

    x = x_ref[...]                                 # (rows, E) f32, rows = bt * S
    rows, emb = x.shape
    del rows
    head_dim = emb // num_heads
    scale = 1.0 / (head_dim ** 0.5)

    # --- LayerNorm 1 (f32 statistics) ---
    h_bf = _layer_norm(x, ln1g_ref[...], ln1b_ref[...]).astype(bf16)

    # --- fused QKV projection over the whole row tile (one big MXU op) ---
    qkv = jnp.dot(h_bf, wqkv_ref[...], preferred_element_type=f32) + bqkv_ref[...]
    # Pre-scale the Q columns by 1/sqrt(D) before the bf16 cast, store to scratch so
    # the per-sample loop can slice with pl.ds.
    lane = jax.lax.broadcasted_iota(jnp.int32, (1, 3 * emb), 1)
    col_scale = jnp.where(lane < emb, f32(scale), f32(1.0))
    qkv_ref[...] = (qkv * col_scale).astype(bf16)

    # --- additive causal mask: -10000 * triu(ones(S, S), 1); built once per tile ---
    row_i = jax.lax.broadcasted_iota(jnp.int32, (seq_len, seq_len), 0)
    col_i = jax.lax.broadcasted_iota(jnp.int32, (seq_len, seq_len), 1)
    mask = jnp.where(col_i > row_i, f32(-10000.0), f32(0.0))

    # --- per-sample causal multi-head attention; heads land in their lane range of
    #     the (rows, E) context scratch (full-K Wo matmul afterwards) ---
    def sample_body(b, carry):
        r0 = pl.multiple_of(b * seq_len, seq_len)
        rs = pl.ds(r0, seq_len)
        qkv_b = qkv_ref[rs, :]                     # (S, 3E) bf16
        for hd in range(num_heads):
            c0 = hd * head_dim
            qh = qkv_b[:, c0:c0 + head_dim]
            kh = qkv_b[:, emb + c0:emb + c0 + head_dim]
            vh = qkv_b[:, 2 * emb + c0:2 * emb + c0 + head_dim]
            # scores = qh @ kh.T without materializing a transpose.
            scores = jax.lax.dot_general(
                qh, kh, (((1,), (1,)), ((), ())),
                preferred_element_type=f32) + mask
            scores = scores - jnp.max(scores, axis=-1, keepdims=True)
            p = jnp.exp(scores)
            p = p * pl.reciprocal(jnp.sum(p, axis=-1, keepdims=True), approx=True)
            ho = jnp.dot(p.astype(bf16), vh, preferred_element_type=f32)   # (S, D)
            ctx_ref[rs, c0:c0 + head_dim] = ho.astype(bf16)
        return carry

    jax.lax.fori_loop(0, samples_per_tile, sample_body, 0)

    # --- single full-K output projection ---
    attn = jnp.dot(ctx_ref[...], wo_ref[...], preferred_element_type=f32) + bo_ref[...]

    # --- residual 1 ---
    x1 = x + attn

    # --- LayerNorm 2 + FFN (Dropout p=0 is identity) ---
    h2 = _layer_norm(x1, ln2g_ref[...], ln2b_ref[...]).astype(bf16)
    f = jnp.dot(h2, w1_ref[...], preferred_element_type=f32) + b1_ref[...]
    f = _gelu_exact(f)
    f = jnp.dot(f.astype(bf16), w2_ref[...], preferred_element_type=f32) + b2_ref[...]

    o_ref[...] = x1 + f


# ---------------------------------------------------------------------------
# Wrapper-side sizing helpers
# ---------------------------------------------------------------------------

def _default_rows_target():
    """Bigger row tiles on v5e/v6e (128 MiB VMEM), tighter on v7x (64 MiB)."""
    try:
        if pltpu.get_tpu_info().vmem_capacity_bytes <= (64 << 20):
            return 256
    except Exception:
        pass
    return 512


def _vmem_limit_bytes(rows, emb):
    """Estimate: bf16 weights (double-buffered) + f32 I/O tiles + scratch + intermediates."""
    weights = 2 * emb * emb * (3 + 1 + 4 + 4)          # wqkv + wo + w1 + w2, bf16 bytes
    io_tiles = 4 * rows * emb * 4                      # x + out tiles, double-buffered f32
    scratch = rows * (3 * emb + emb) * 2               # qkv + ctx bf16 scratch
    interm = rows * (4 * emb) * 4 + rows * (3 * emb) * 4  # FFN hidden + qkv f32 values
    est = 2 * weights + io_tiles + scratch + interm + (8 << 20)
    try:
        cap = pltpu.get_tpu_info().vmem_capacity_bytes - (8 << 20)
    except Exception:
        cap = 56 << 20
    cap = min(cap, 100 << 20)
    return int(max(32 << 20, min(est, cap)))


def _pick_samples_per_tile(batch, seq, rows_target):
    """Largest divisor of batch with bt*seq near rows_target, (8,128)-legal tiles,
    preferring >= 2 grid tiles so the 'parallel' axis can shard across TensorCores."""
    divisors = [c for c in range(1, batch + 1) if batch % c == 0]
    legal = [c for c in divisors
             if (batch // c == 1) or ((c * seq) % 8 == 0)]
    multi = [c for c in legal if batch // c >= 2]
    pool = multi if multi else legal
    fitting = [c for c in pool if c * seq <= max(seq, rows_target)]
    return max(fitting) if fitting else min(pool)


def prepare_params(params):
    """One-time weight prep: pre-transpose to (in, out), fuse QKV, cast MXU weights to bf16."""
    bf16 = jnp.bfloat16
    wqkv = jnp.concatenate(
        [params["wq"].T, params["wk"].T, params["wv"].T], axis=1).astype(bf16)
    bqkv = jnp.concatenate(
        [params["bq"], params["bk"], params["bv"]], axis=1).astype(jnp.float32)
    return {
        "ln1_g": params["ln1_g"], "ln1_b": params["ln1_b"],
        "ln2_g": params["ln2_g"], "ln2_b": params["ln2_b"],
        "wqkv": wqkv, "bqkv": bqkv,
        "wo": params["wo"].T.astype(bf16), "bo": params["bo"],
        "w1": params["w1"].T.astype(bf16), "b1": params["b1"],
        "w2": params["w2"].T.astype(bf16), "b2": params["b2"],
    }


def transformer_block(x, prep, num_heads, rows_per_tile_target=None):
    """x: (B, S, E) float32. prep: output of prepare_params()."""
    batch, seq, emb = x.shape
    assert emb % num_heads == 0

    if rows_per_tile_target is None:
        rows_per_tile_target = _default_rows_target()
    bt = _pick_samples_per_tile(batch, seq, rows_per_tile_target)
    rows = bt * seq
    num_tiles = batch // bt

    # Fold batch into the matmul M dimension (lane-dense (B*S, E) layout).
    x2 = x.reshape(batch * seq, emb)

    def full_spec(arr):
        nd = arr.ndim
        return pl.BlockSpec(arr.shape, lambda i, nd=nd: (0,) * nd)

    in_specs = [
        pl.BlockSpec((rows, emb), lambda i: (i, 0)),          # x row tile
        full_spec(prep["ln1_g"]), full_spec(prep["ln1_b"]),
        full_spec(prep["wqkv"]), full_spec(prep["bqkv"]),
        full_spec(prep["wo"]), full_spec(prep["bo"]),
        full_spec(prep["ln2_g"]), full_spec(prep["ln2_b"]),
        full_spec(prep["w1"]), full_spec(prep["b1"]),
        full_spec(prep["w2"]), full_spec(prep["b2"]),
    ]

    kernel = functools.partial(
        transformer_block_kernel,
        num_heads=num_heads, seq_len=seq, samples_per_tile=bt)

    out2 = pl.pallas_call(
        kernel,
        out_shape=jax.ShapeDtypeStruct((batch * seq, emb), jnp.float32),
        grid_spec=pltpu.PrefetchScalarGridSpec(
            num_scalar_prefetch=0,
            grid=(num_tiles,),
            in_specs=in_specs,
            out_specs=pl.BlockSpec((rows, emb), lambda i: (i, 0)),
            scratch_shapes=[
                pltpu.VMEM((rows, 3 * emb), jnp.bfloat16),    # fused QKV (scaled Q)
                pltpu.VMEM((rows, emb), jnp.bfloat16),        # per-head context
            ],
        ),
        compiler_params=pltpu.CompilerParams(
            dimension_semantics=("parallel",),                # row tiles are independent
            vmem_limit_bytes=_vmem_limit_bytes(rows, emb),
        ),
    )(
        x2,
        prep["ln1_g"], prep["ln1_b"],
        prep["wqkv"], prep["bqkv"],
        prep["wo"], prep["bo"],
        prep["ln2_g"], prep["ln2_b"],
        prep["w1"], prep["b1"],
        prep["w2"], prep["b2"],
    )
    return out2.reshape(batch, seq, emb)


def init_params(key, emb):
    """Deterministic synthetic parameter init (shapes match nn.MultiheadAttention / nn.Linear)."""
    hid = 4 * emb
    ks = jax.random.split(key, 12)
    scale = 0.02
    return {
        "ln1_g": jnp.ones((1, emb), jnp.float32),
        "ln1_b": jnp.zeros((1, emb), jnp.float32),
        "ln2_g": jnp.ones((1, emb), jnp.float32),
        "ln2_b": jnp.zeros((1, emb), jnp.float32),
        "wq": scale * jax.random.normal(ks[0], (emb, emb), jnp.float32),
        "wk": scale * jax.random.normal(ks[1], (emb, emb), jnp.float32),
        "wv": scale * jax.random.normal(ks[2], (emb, emb), jnp.float32),
        "bq": scale * jax.random.normal(ks[3], (1, emb), jnp.float32),
        "bk": scale * jax.random.normal(ks[4], (1, emb), jnp.float32),
        "bv": scale * jax.random.normal(ks[5], (1, emb), jnp.float32),
        "wo": scale * jax.random.normal(ks[6], (emb, emb), jnp.float32),
        "bo": scale * jax.random.normal(ks[7], (1, emb), jnp.float32),
        "w1": scale * jax.random.normal(ks[8], (hid, emb), jnp.float32),
        "b1": scale * jax.random.normal(ks[9], (1, hid), jnp.float32),
        "w2": scale * jax.random.normal(ks[10], (emb, hid), jnp.float32),
        "b2": scale * jax.random.normal(ks[11], (1, emb), jnp.float32),
    }


def reference_block(x, params, num_heads):
    """Pure-JAX f32 reference mirroring the PyTorch forward."""
    batch, s_len, emb = x.shape
    head_dim = emb // num_heads
    scale = 1.0 / (head_dim ** 0.5)

    def ln(v, g, b):
        mu = jnp.mean(v, axis=-1, keepdims=True)
        var = jnp.mean((v - mu) ** 2, axis=-1, keepdims=True)
        return (v - mu) / jnp.sqrt(var + 1e-5) * g + b

    row = jnp.arange(s_len)[:, None]
    col = jnp.arange(s_len)[None, :]
    mask = jnp.where(col > row, -10000.0, 0.0)

    residue = x
    h = ln(x, params["ln1_g"], params["ln1_b"])
    q = h @ params["wq"].T + params["bq"]
    k = h @ params["wk"].T + params["bk"]
    v = h @ params["wv"].T + params["bv"]
    q = q.reshape(batch, s_len, num_heads, head_dim).transpose(0, 2, 1, 3)
    k = k.reshape(batch, s_len, num_heads, head_dim).transpose(0, 2, 1, 3)
    v = v.reshape(batch, s_len, num_heads, head_dim).transpose(0, 2, 1, 3)
    scores = jnp.einsum("bhqd,bhkd->bhqk", q, k) * scale + mask
    p = jax.nn.softmax(scores, axis=-1)
    attn = jnp.einsum("bhqk,bhkd->bhqd", p, v).transpose(0, 2, 1, 3).reshape(batch, s_len, emb)
    attn = attn @ params["wo"].T + params["bo"]
    x1 = residue + attn
    h2 = ln(x1, params["ln2_g"], params["ln2_b"])
    f = h2 @ params["w1"].T + params["b1"]
    f = jax.nn.gelu(f, approximate=False)
    f = f @ params["w2"].T + params["b2"]
    return x1 + f


if __name__ == "__main__":
    batch, seq, embdim, headcnt = 2, 8, 32, 4   # small shapes consistent with the module
    key = jax.random.PRNGKey(0)
    kx, kp = jax.random.split(key)
    x = jax.random.normal(kx, (batch, seq, embdim), jnp.float32)
    params = init_params(kp, embdim)

    prep = prepare_params(params)               # one-time weight prep (hoisted out of forward)
    out = transformer_block(x, prep, headcnt)
    out = jax.block_until_ready(out)

    ref = reference_block(x, params, headcnt)
    assert out.shape == (batch, seq, embdim)
    # Tolerance accounts for bf16 MXU inputs (f32 accumulation) vs the f32 reference.
    assert jnp.allclose(out, ref, rtol=1e-2, atol=1e-2), "mismatch vs pure-JAX reference"

    print("KERNEL_OK")
</pallas_src>

<mosaic_0001>
module attributes {stable_mosaic.version = 11 : i64} {
  func.func @transformer_block_kernel(%arg0: i32, %arg1: memref<8x32xf32, #tpu.memory_space<vmem>>, %arg2: memref<1x32xf32, #tpu.memory_space<vmem>>, %arg3: memref<1x32xf32, #tpu.memory_space<vmem>>, %arg4: memref<32x96xbf16, #tpu.memory_space<vmem>>, %arg5: memref<1x96xf32, #tpu.memory_space<vmem>>, %arg6: memref<32x32xbf16, #tpu.memory_space<vmem>>, %arg7: memref<1x32xf32, #tpu.memory_space<vmem>>, %arg8: memref<1x32xf32, #tpu.memory_space<vmem>>, %arg9: memref<1x32xf32, #tpu.memory_space<vmem>>, %arg10: memref<32x128xbf16, #tpu.memory_space<vmem>>, %arg11: memref<1x128xf32, #tpu.memory_space<vmem>>, %arg12: memref<128x32xbf16, #tpu.memory_space<vmem>>, %arg13: memref<1x32xf32, #tpu.memory_space<vmem>>, %arg14: memref<8x32xf32, #tpu.memory_space<vmem>>, %arg15: memref<8x96xbf16, #tpu.memory_space<vmem>>, %arg16: memref<8x32xbf16, #tpu.memory_space<vmem>>) attributes {dimension_semantics = [#tpu.dimension_semantics<parallel>], iteration_bounds = array<i64: 2>, scalar_prefetch = 0 : i64, scratch_operands = 2 : i64, tpu.core_type = #tpu.core_type<tc>, window_params = [{transform_indices = @transform_0, window_bounds = array<i64: 8, 32>}, {pipeline_mode = #tpu.pipeline_mode<synchronous>, transform_indices = @transform_1, window_bounds = array<i64: 1, 32>}, {pipeline_mode = #tpu.pipeline_mode<synchronous>, transform_indices = @transform_2, window_bounds = array<i64: 1, 32>}, {pipeline_mode = #tpu.pipeline_mode<synchronous>, transform_indices = @transform_3, window_bounds = array<i64: 32, 96>}, {pipeline_mode = #tpu.pipeline_mode<synchronous>, transform_indices = @transform_4, window_bounds = array<i64: 1, 96>}, {pipeline_mode = #tpu.pipeline_mode<synchronous>, transform_indices = @transform_5, window_bounds = array<i64: 32, 32>}, {pipeline_mode = #tpu.pipeline_mode<synchronous>, transform_indices = @transform_6, window_bounds = array<i64: 1, 32>}, {pipeline_mode = #tpu.pipeline_mode<synchronous>, transform_indices = @transform_7, window_bounds = array<i64: 1, 32>}, {pipeline_mode = #tpu.pipeline_mode<synchronous>, transform_indices = @transform_8, window_bounds = array<i64: 1, 32>}, {pipeline_mode = #tpu.pipeline_mode<synchronous>, transform_indices = @transform_9, window_bounds = array<i64: 32, 128>}, {pipeline_mode = #tpu.pipeline_mode<synchronous>, transform_indices = @transform_10, window_bounds = array<i64: 1, 128>}, {pipeline_mode = #tpu.pipeline_mode<synchronous>, transform_indices = @transform_11, window_bounds = array<i64: 128, 32>}, {pipeline_mode = #tpu.pipeline_mode<synchronous>, transform_indices = @transform_12, window_bounds = array<i64: 1, 32>}, {transform_indices = @transform_13, window_bounds = array<i64: 8, 32>}]} {
    %c0 = arith.constant 0 : index
    %c0_0 = arith.constant 0 : index
    %0 = vector.load %arg1[%c0, %c0_0] : memref<8x32xf32, #tpu.memory_space<vmem>>, vector<8x32xf32>
    %c0_1 = arith.constant 0 : index
    %c0_2 = arith.constant 0 : index
    %1 = vector.load %arg2[%c0_1, %c0_2] : memref<1x32xf32, #tpu.memory_space<vmem>>, vector<1x32xf32>
    %c0_3 = arith.constant 0 : index
    %c0_4 = arith.constant 0 : index
    %2 = vector.load %arg3[%c0_3, %c0_4] : memref<1x32xf32, #tpu.memory_space<vmem>>, vector<1x32xf32>
    %cst = arith.constant dense<0.000000e+00> : vector<8xf32>
    %3 = vector.multi_reduction <add>, %0, %cst [1] : vector<8x32xf32> to vector<8xf32>
    %4 = vector.shape_cast %3 : vector<8xf32> to vector<8x1xf32>
    %cst_5 = arith.constant 3.200000e+01 : f32
    %5 = vector.broadcast %cst_5 : f32 to vector<8x1xf32>
    %6 = arith.divf %4, %5 : vector<8x1xf32>
    %7 = vector.broadcast %6 : vector<8x1xf32> to vector<8x32xf32>
    %8 = arith.subf %0, %7 : vector<8x32xf32>
    %9 = arith.mulf %8, %8 : vector<8x32xf32>
    %cst_6 = arith.constant dense<0.000000e+00> : vector<8xf32>
    %10 = vector.multi_reduction <add>, %9, %cst_6 [1] : vector<8x32xf32> to vector<8xf32>
    %11 = vector.shape_cast %10 : vector<8xf32> to vector<8x1xf32>
    %cst_7 = arith.constant 3.200000e+01 : f32
    %12 = vector.broadcast %cst_7 : f32 to vector<8x1xf32>
    %13 = arith.divf %11, %12 : vector<8x1xf32>
    %14 = vector.broadcast %6 : vector<8x1xf32> to vector<8x32xf32>
    %15 = arith.subf %0, %14 : vector<8x32xf32>
    %cst_8 = arith.constant 9.99999974E-6 : f32
    %16 = vector.broadcast %cst_8 : f32 to vector<8x1xf32>
    %17 = arith.addf %13, %16 : vector<8x1xf32>
    %18 = math.rsqrt %17 : vector<8x1xf32>
    %19 = vector.broadcast %18 : vector<8x1xf32> to vector<8x32xf32>
    %20 = arith.mulf %15, %19 : vector<8x32xf32>
    %21 = vector.broadcast %1 : vector<1x32xf32> to vector<8x32xf32>
    %22 = arith.mulf %20, %21 : vector<8x32xf32>
    %23 = vector.broadcast %2 : vector<1x32xf32> to vector<8x32xf32>
    %24 = arith.addf %22, %23 : vector<8x32xf32>
    %25 = arith.truncf %24 : vector<8x32xf32> to vector<8x32xbf16>
    %c0_9 = arith.constant 0 : index
    %c0_10 = arith.constant 0 : index
    %26 = vector.load %arg4[%c0_9, %c0_10] : memref<32x96xbf16, #tpu.memory_space<vmem>>, vector<32x96xbf16>
    %cst_11 = arith.constant dense<0.000000e+00> : vector<8x96xf32>
    %27 = tpu.matmul %25, %26, %cst_11 {dimension_numbers = #tpu.dot_dimension_numbers<[1], [0], [0], [1], [0, 0, 1, 1], [], []>} : vector<8x32xbf16>, vector<32x96xbf16>, vector<8x96xf32> -> vector<8x96xf32>
    %c0_12 = arith.constant 0 : index
    %c0_13 = arith.constant 0 : index
    %28 = vector.load %arg5[%c0_12, %c0_13] : memref<1x96xf32, #tpu.memory_space<vmem>>, vector<1x96xf32>
    %29 = vector.broadcast %28 : vector<1x96xf32> to vector<8x96xf32>
    %30 = arith.addf %27, %29 : vector<8x96xf32>
    %31 = tpu.iota {dimensions = array<i32: 1>} : vector<1x96xi32>
    %c32_i32 = arith.constant 32 : i32
    %32 = vector.broadcast %c32_i32 : i32 to vector<1x96xi32>
    %33 = arith.cmpi slt, %31, %32 : vector<1x96xi32>
    %cst_14 = arith.constant 0.353553385 : f32
    %cst_15 = arith.constant 1.000000e+00 : f32
    %34 = vector.broadcast %cst_14 : f32 to vector<1x96xf32>
    %35 = vector.broadcast %cst_15 : f32 to vector<1x96xf32>
    %36 = arith.select %33, %34, %35 : vector<1x96xi1>, vector<1x96xf32>
    %37 = vector.broadcast %36 : vector<1x96xf32> to vector<8x96xf32>
    %38 = arith.mulf %30, %37 : vector<8x96xf32>
    %39 = arith.truncf %38 : vector<8x96xf32> to vector<8x96xbf16>
    %c0_16 = arith.constant 0 : index
    %c0_17 = arith.constant 0 : index
    %40 = vector.load %arg15[%c0_16, %c0_17] : memref<8x96xbf16, #tpu.memory_space<vmem>>, vector<8x96xbf16>
    tpu.vector_store %arg15[%c0_16, %c0_17], %39 {strides = array<i32>} : memref<8x96xbf16, #tpu.memory_space<vmem>>, vector<8x96xbf16>,
    %41 = tpu.iota {dimensions = array<i32: 0>} : vector<8x8xi32>
    %42 = tpu.iota {dimensions = array<i32: 1>} : vector<8x8xi32>
    %43 = arith.cmpi sgt, %42, %41 : vector<8x8xi32>
    %cst_18 = arith.constant -1.000000e+04 : f32
    %cst_19 = arith.constant 0.000000e+00 : f32
    %44 = vector.broadcast %cst_18 : f32 to vector<8x8xf32>
    %45 = vector.broadcast %cst_19 : f32 to vector<8x8xf32>
    %46 = arith.select %43, %44, %45 : vector<8x8xi1>, vector<8x8xf32>
    %c0_i32 = arith.constant 0 : i32
    %c8_i32 = arith.constant 8 : i32
    %47 = arith.muli %c0_i32, %c8_i32 : i32
    %48 = tpu.assume_multiple %47, 8 : i32
    %49 = arith.index_cast %48 : i32 to index
    %c0_20 = arith.constant 0 : index
    %50 = vector.load %arg15[%49, %c0_20] : memref<8x96xbf16, #tpu.memory_space<vmem>>, vector<8x96xbf16>
    %51 = vector.extract_strided_slice %50 {offsets = [0, 0], sizes = [8, 8], strides = [1, 1]} : vector<8x96xbf16> to vector<8x8xbf16>
    %52 = vector.extract_strided_slice %50 {offsets = [0, 32], sizes = [8, 8], strides = [1, 1]} : vector<8x96xbf16> to vector<8x8xbf16>
    %53 = vector.extract_strided_slice %50 {offsets = [0, 64], sizes = [8, 8], strides = [1, 1]} : vector<8x96xbf16> to vector<8x8xbf16>
    %cst_21 = arith.constant dense<0.000000e+00> : vector<8x8xf32>
    %54 = tpu.matmul %51, %52, %cst_21 {dimension_numbers = #tpu.dot_dimension_numbers<[1], [1], [0], [0], [0, 0, 1, 0], [], []>} : vector<8x8xbf16>, vector<8x8xbf16>, vector<8x8xf32> -> vector<8x8xf32>
    %55 = arith.addf %54, %46 : vector<8x8xf32>
    %cst_22 = arith.constant dense<0xFF800000> : vector<8xf32>
    %56 = vector.multi_reduction <maximumf>, %55, %cst_22 [1] : vector<8x8xf32> to vector<8xf32>
    %57 = vector.shape_cast %56 : vector<8xf32> to vector<8x1xf32>
    %58 = vector.broadcast %57 : vector<8x1xf32> to vector<8x8xf32>
    %59 = arith.subf %55, %58 : vector<8x8xf32>
    %60 = math.exp %59 : vector<8x8xf32>
    %cst_23 = arith.constant dense<0.000000e+00> : vector<8xf32>
    %61 = vector.multi_reduction <add>, %60, %cst_23 [1] : vector<8x8xf32> to vector<8xf32>
    %62 = vector.shape_cast %61 : vector<8xf32> to vector<8x1xf32>
    %63 = tpu.reciprocal %62 {approx = true} : vector<8x1xf32> -> vector<8x1xf32>
    %64 = vector.broadcast %63 : vector<8x1xf32> to vector<8x8xf32>
    %65 = arith.mulf %60, %64 : vector<8x8xf32>
    %66 = arith.truncf %65 : vector<8x8xf32> to vector<8x8xbf16>
    %cst_24 = arith.constant dense<0.000000e+00> : vector<8x8xf32>
    %67 = tpu.matmul %66, %53, %cst_24 {dimension_numbers = #tpu.dot_dimension_numbers<[1], [0], [0], [1], [0, 0, 1, 1], [], []>} : vector<8x8xbf16>, vector<8x8xbf16>, vector<8x8xf32> -> vector<8x8xf32>
    %68 = arith.truncf %67 : vector<8x8xf32> to vector<8x8xbf16>
    %69 = arith.index_cast %48 : i32 to index
    %c0_25 = arith.constant 0 : index
    %70 = vector.load %arg16[%69, %c0_25] : memref<8x32xbf16, #tpu.memory_space<vmem>>, vector<8x8xbf16>
    tpu.vector_store %arg16[%69, %c0_25], %68 {strides = array<i32>} : memref<8x32xbf16, #tpu.memory_space<vmem>>, vector<8x8xbf16>,
    %71 = vector.extract_strided_slice %50 {offsets = [0, 8], sizes = [8, 8], strides = [1, 1]} : vector<8x96xbf16> to vector<8x8xbf16>
    %72 = vector.extract_strided_slice %50 {offsets = [0, 40], sizes = [8, 8], strides = [1, 1]} : vector<8x96xbf16> to vector<8x8xbf16>
    %73 = vector.extract_strided_slice %50 {offsets = [0, 72], sizes = [8, 8], strides = [1, 1]} : vector<8x96xbf16> to vector<8x8xbf16>
    %cst_26 = arith.constant dense<0.000000e+00> : vector<8x8xf32>
    %74 = tpu.matmul %71, %72, %cst_26 {dimension_numbers = #tpu.dot_dimension_numbers<[1], [1], [0], [0], [0, 0, 1, 0], [], []>} : vector<8x8xbf16>, vector<8x8xbf16>, vector<8x8xf32> -> vector<8x8xf32>
    %75 = arith.addf %74, %46 : vector<8x8xf32>
    %cst_27 = arith.constant dense<0xFF800000> : vector<8xf32>
    %76 = vector.multi_reduction <maximumf>, %75, %cst_27 [1] : vector<8x8xf32> to vector<8xf32>
    %77 = vector.shape_cast %76 : vector<8xf32> to vector<8x1xf32>
    %78 = vector.broadcast %77 : vector<8x1xf32> to vector<8x8xf32>
    %79 = arith.subf %75, %78 : vector<8x8xf32>
    %80 = math.exp %79 : vector<8x8xf32>
    %cst_28 = arith.constant dense<0.000000e+00> : vector<8xf32>
    %81 = vector.multi_reduction <add>, %80, %cst_28 [1] : vector<8x8xf32> to vector<8xf32>
    %82 = vector.shape_cast %81 : vector<8xf32> to vector<8x1xf32>
    %83 = tpu.reciprocal %82 {approx = true} : vector<8x1xf32> -> vector<8x1xf32>
    %84 = vector.broadcast %83 : vector<8x1xf32> to vector<8x8xf32>
    %85 = arith.mulf %80, %84 : vector<8x8xf32>
    %86 = arith.truncf %85 : vector<8x8xf32> to vector<8x8xbf16>
    %cst_29 = arith.constant dense<0.000000e+00> : vector<8x8xf32>
    %87 = tpu.matmul %86, %73, %cst_29 {dimension_numbers = #tpu.dot_dimension_numbers<[1], [0], [0], [1], [0, 0, 1, 1], [], []>} : vector<8x8xbf16>, vector<8x8xbf16>, vector<8x8xf32> -> vector<8x8xf32>
    %88 = arith.truncf %87 : vector<8x8xf32> to vector<8x8xbf16>
    %89 = arith.index_cast %48 : i32 to index
    %c8 = arith.constant 8 : index
    %90 = vector.load %arg16[%89, %c8] : memref<8x32xbf16, #tpu.memory_space<vmem>>, vector<8x8xbf16>
    tpu.vector_store %arg16[%89, %c8], %88 {strides = array<i32>} : memref<8x32xbf16, #tpu.memory_space<vmem>>, vector<8x8xbf16>,
    %91 = vector.extract_strided_slice %50 {offsets = [0, 16], sizes = [8, 8], strides = [1, 1]} : vector<8x96xbf16> to vector<8x8xbf16>
    %92 = vector.extract_strided_slice %50 {offsets = [0, 48], sizes = [8, 8], strides = [1, 1]} : vector<8x96xbf16> to vector<8x8xbf16>
    %93 = vector.extract_strided_slice %50 {offsets = [0, 80], sizes = [8, 8], strides = [1, 1]} : vector<8x96xbf16> to vector<8x8xbf16>
    %cst_30 = arith.constant dense<0.000000e+00> : vector<8x8xf32>
    %94 = tpu.matmul %91, %92, %cst_30 {dimension_numbers = #tpu.dot_dimension_numbers<[1], [1], [0], [0], [0, 0, 1, 0], [], []>} : vector<8x8xbf16>, vector<8x8xbf16>, vector<8x8xf32> -> vector<8x8xf32>
    %95 = arith.addf %94, %46 : vector<8x8xf32>
    %cst_31 = arith.constant dense<0xFF800000> : vector<8xf32>
    %96 = vector.multi_reduction <maximumf>, %95, %cst_31 [1] : vector<8x8xf32> to vector<8xf32>
    %97 = vector.shape_cast %96 : vector<8xf32> to vector<8x1xf32>
    %98 = vector.broadcast %97 : vector<8x1xf32> to vector<8x8xf32>
    %99 = arith.subf %95, %98 : vector<8x8xf32>
    %100 = math.exp %99 : vector<8x8xf32>
    %cst_32 = arith.constant dense<0.000000e+00> : vector<8xf32>
    %101 = vector.multi_reduction <add>, %100, %cst_32 [1] : vector<8x8xf32> to vector<8xf32>
    %102 = vector.shape_cast %101 : vector<8xf32> to vector<8x1xf32>
    %103 = tpu.reciprocal %102 {approx = true} : vector<8x1xf32> -> vector<8x1xf32>
    %104 = vector.broadcast %103 : vector<8x1xf32> to vector<8x8xf32>
    %105 = arith.mulf %100, %104 : vector<8x8xf32>
    %106 = arith.truncf %105 : vector<8x8xf32> to vector<8x8xbf16>
    %cst_33 = arith.constant dense<0.000000e+00> : vector<8x8xf32>
    %107 = tpu.matmul %106, %93, %cst_33 {dimension_numbers = #tpu.dot_dimension_numbers<[1], [0], [0], [1], [0, 0, 1, 1], [], []>} : vector<8x8xbf16>, vector<8x8xbf16>, vector<8x8xf32> -> vector<8x8xf32>
    %108 = arith.truncf %107 : vector<8x8xf32> to vector<8x8xbf16>
    %109 = arith.index_cast %48 : i32 to index
    %c16 = arith.constant 16 : index
    %110 = vector.load %arg16[%109, %c16] : memref<8x32xbf16, #tpu.memory_space<vmem>>, vector<8x8xbf16>
    tpu.vector_store %arg16[%109, %c16], %108 {strides = array<i32>} : memref<8x32xbf16, #tpu.memory_space<vmem>>, vector<8x8xbf16>,
    %111 = vector.extract_strided_slice %50 {offsets = [0, 24], sizes = [8, 8], strides = [1, 1]} : vector<8x96xbf16> to vector<8x8xbf16>
    %112 = vector.extract_strided_slice %50 {offsets = [0, 56], sizes = [8, 8], strides = [1, 1]} : vector<8x96xbf16> to vector<8x8xbf16>
    %113 = vector.extract_strided_slice %50 {offsets = [0, 88], sizes = [8, 8], strides = [1, 1]} : vector<8x96xbf16> to vector<8x8xbf16>
    %cst_34 = arith.constant dense<0.000000e+00> : vector<8x8xf32>
    %114 = tpu.matmul %111, %112, %cst_34 {dimension_numbers = #tpu.dot_dimension_numbers<[1], [1], [0], [0], [0, 0, 1, 0], [], []>} : vector<8x8xbf16>, vector<8x8xbf16>, vector<8x8xf32> -> vector<8x8xf32>
    %115 = arith.addf %114, %46 : vector<8x8xf32>
    %cst_35 = arith.constant dense<0xFF800000> : vector<8xf32>
    %116 = vector.multi_reduction <maximumf>, %115, %cst_35 [1] : vector<8x8xf32> to vector<8xf32>
    %117 = vector.shape_cast %116 : vector<8xf32> to vector<8x1xf32>
    %118 = vector.broadcast %117 : vector<8x1xf32> to vector<8x8xf32>
    %119 = arith.subf %115, %118 : vector<8x8xf32>
    %120 = math.exp %119 : vector<8x8xf32>
    %cst_36 = arith.constant dense<0.000000e+00> : vector<8xf32>
    %121 = vector.multi_reduction <add>, %120, %cst_36 [1] : vector<8x8xf32> to vector<8xf32>
    %122 = vector.shape_cast %121 : vector<8xf32> to vector<8x1xf32>
    %123 = tpu.reciprocal %122 {approx = true} : vector<8x1xf32> -> vector<8x1xf32>
    %124 = vector.broadcast %123 : vector<8x1xf32> to vector<8x8xf32>
    %125 = arith.mulf %120, %124 : vector<8x8xf32>
    %126 = arith.truncf %125 : vector<8x8xf32> to vector<8x8xbf16>
    %cst_37 = arith.constant dense<0.000000e+00> : vector<8x8xf32>
    %127 = tpu.matmul %126, %113, %cst_37 {dimension_numbers = #tpu.dot_dimension_numbers<[1], [0], [0], [1], [0, 0, 1, 1], [], []>} : vector<8x8xbf16>, vector<8x8xbf16>, vector<8x8xf32> -> vector<8x8xf32>
    %128 = arith.truncf %127 : vector<8x8xf32> to vector<8x8xbf16>
    %129 = arith.index_cast %48 : i32 to index
    %c24 = arith.constant 24 : index
    %130 = vector.load %arg16[%129, %c24] : memref<8x32xbf16, #tpu.memory_space<vmem>>, vector<8x8xbf16>
    tpu.vector_store %arg16[%129, %c24], %128 {strides = array<i32>} : memref<8x32xbf16, #tpu.memory_space<vmem>>, vector<8x8xbf16>,
    %c1_i32 = arith.constant 1 : i32
    %c0_38 = arith.constant 0 : index
    %c0_39 = arith.constant 0 : index
    %131 = vector.load %arg16[%c0_38, %c0_39] : memref<8x32xbf16, #tpu.memory_space<vmem>>, vector<8x32xbf16>
    %c0_40 = arith.constant 0 : index
    %c0_41 = arith.constant 0 : index
    %132 = vector.load %arg6[%c0_40, %c0_41] : memref<32x32xbf16, #tpu.memory_space<vmem>>, vector<32x32xbf16>
    %cst_42 = arith.constant dense<0.000000e+00> : vector<8x32xf32>
    %133 = tpu.matmul %131, %132, %cst_42 {dimension_numbers = #tpu.dot_dimension_numbers<[1], [0], [0], [1], [0, 0, 1, 1], [], []>} : vector<8x32xbf16>, vector<32x32xbf16>, vector<8x32xf32> -> vector<8x32xf32>
    %c0_43 = arith.constant 0 : index
    %c0_44 = arith.constant 0 : index
    %134 = vector.load %arg7[%c0_43, %c0_44] : memref<1x32xf32, #tpu.memory_space<vmem>>, vector<1x32xf32>
    %135 = vector.broadcast %134 : vector<1x32xf32> to vector<8x32xf32>
    %136 = arith.addf %133, %135 : vector<8x32xf32>
    %137 = arith.addf %0, %136 : vector<8x32xf32>
    %c0_45 = arith.constant 0 : index
    %c0_46 = arith.constant 0 : index
    %138 = vector.load %arg8[%c0_45, %c0_46] : memref<1x32xf32, #tpu.memory_space<vmem>>, vector<1x32xf32>
    %c0_47 = arith.constant 0 : index
    %c0_48 = arith.constant 0 : index
    %139 = vector.load %arg9[%c0_47, %c0_48] : memref<1x32xf32, #tpu.memory_space<vmem>>, vector<1x32xf32>
    %cst_49 = arith.constant dense<0.000000e+00> : vector<8xf32>
    %140 = vector.multi_reduction <add>, %137, %cst_49 [1] : vector<8x32xf32> to vector<8xf32>
    %141 = vector.shape_cast %140 : vector<8xf32> to vector<8x1xf32>
    %cst_50 = arith.constant 3.200000e+01 : f32
    %142 = vector.broadcast %cst_50 : f32 to vector<8x1xf32>
    %143 = arith.divf %141, %142 : vector<8x1xf32>
    %144 = vector.broadcast %143 : vector<8x1xf32> to vector<8x32xf32>
    %145 = arith.subf %137, %144 : vector<8x32xf32>
    %146 = arith.mulf %145, %145 : vector<8x32xf32>
    %cst_51 = arith.constant dense<0.000000e+00> : vector<8xf32>
    %147 = vector.multi_reduction <add>, %146, %cst_51 [1] : vector<8x32xf32> to vector<8xf32>
    %148 = vector.shape_cast %147 : vector<8xf32> to vector<8x1xf32>
    %cst_52 = arith.constant 3.200000e+01 : f32
    %149 = vector.broadcast %cst_52 : f32 to vector<8x1xf32>
    %150 = arith.divf %148, %149 : vector<8x1xf32>
    %151 = vector.broadcast %143 : vector<8x1xf32> to vector<8x32xf32>
    %152 = arith.subf %137, %151 : vector<8x32xf32>
    %cst_53 = arith.constant 9.99999974E-6 : f32
    %153 = vector.broadcast %cst_53 : f32 to vector<8x1xf32>
    %154 = arith.addf %150, %153 : vector<8x1xf32>
    %155 = math.rsqrt %154 : vector<8x1xf32>
    %156 = vector.broadcast %155 : vector<8x1xf32> to vector<8x32xf32>
    %157 = arith.mulf %152, %156 : vector<8x32xf32>
    %158 = vector.broadcast %138 : vector<1x32xf32> to vector<8x32xf32>
    %159 = arith.mulf %157, %158 : vector<8x32xf32>
    %160 = vector.broadcast %139 : vector<1x32xf32> to vector<8x32xf32>
    %161 = arith.addf %159, %160 : vector<8x32xf32>
    %162 = arith.truncf %161 : vector<8x32xf32> to vector<8x32xbf16>
    %c0_54 = arith.constant 0 : index
    %c0_55 = arith.constant 0 : index
    %163 = vector.load %arg10[%c0_54, %c0_55] : memref<32x128xbf16, #tpu.memory_space<vmem>>, vector<32x128xbf16>
    %cst_56 = arith.constant dense<0.000000e+00> : vector<8x128xf32>
    %164 = tpu.matmul %162, %163, %cst_56 {dimension_numbers = #tpu.dot_dimension_numbers<[1], [0], [0], [1], [0, 0, 1, 1], [], []>} : vector<8x32xbf16>, vector<32x128xbf16>, vector<8x128xf32> -> vector<8x128xf32>
    %c0_57 = arith.constant 0 : index
    %c0_58 = arith.constant 0 : index
    %165 = vector.load %arg11[%c0_57, %c0_58] : memref<1x128xf32, #tpu.memory_space<vmem>>, vector<1x128xf32>
    %166 = vector.broadcast %165 : vector<1x128xf32> to vector<8x128xf32>
    %167 = arith.addf %164, %166 : vector<8x128xf32>
    %cst_59 = arith.constant 5.000000e-01 : f32
    %168 = vector.broadcast %cst_59 : f32 to vector<8x128xf32>
    %169 = arith.mulf %168, %167 : vector<8x128xf32>
    %cst_60 = arith.constant 0.707106769 : f32
    %170 = vector.broadcast %cst_60 : f32 to vector<8x128xf32>
    %171 = arith.mulf %167, %170 : vector<8x128xf32>
    %172 = math.erf %171 : vector<8x128xf32>
    %cst_61 = arith.constant 1.000000e+00 : f32
    %173 = vector.broadcast %cst_61 : f32 to vector<8x128xf32>
    %174 = arith.addf %173, %172 : vector<8x128xf32>
    %175 = arith.mulf %169, %174 : vector<8x128xf32>
    %176 = arith.truncf %175 : vector<8x128xf32> to vector<8x128xbf16>
    %c0_62 = arith.constant 0 : index
    %c0_63 = arith.constant 0 : index
    %177 = vector.load %arg12[%c0_62, %c0_63] : memref<128x32xbf16, #tpu.memory_space<vmem>>, vector<128x32xbf16>
    %cst_64 = arith.constant dense<0.000000e+00> : vector<8x32xf32>
    %178 = tpu.matmul %176, %177, %cst_64 {dimension_numbers = #tpu.dot_dimension_numbers<[1], [0], [0], [1], [0, 0, 1, 1], [], []>} : vector<8x128xbf16>, vector<128x32xbf16>, vector<8x32xf32> -> vector<8x32xf32>
    %c0_65 = arith.constant 0 : index
    %c0_66 = arith.constant 0 : index
    %179 = vector.load %arg13[%c0_65, %c0_66] : memref<1x32xf32, #tpu.memory_space<vmem>>, vector<1x32xf32>
    %180 = vector.broadcast %179 : vector<1x32xf32> to vector<8x32xf32>
    %181 = arith.addf %178, %180 : vector<8x32xf32>
    %182 = arith.addf %137, %181 : vector<8x32xf32>
    %c0_67 = arith.constant 0 : index
    %c0_68 = arith.constant 0 : index
    %183 = vector.load %arg14[%c0_67, %c0_68] : memref<8x32xf32, #tpu.memory_space<vmem>>, vector<8x32xf32>
    tpu.vector_store %arg14[%c0_67, %c0_68], %182 {strides = array<i32>} : memref<8x32xf32, #tpu.memory_space<vmem>>, vector<8x32xf32>,
    return
  }
  func.func @transform_0(%arg0: i32) -> (i32, i32) {
    %c0_i32 = arith.constant 0 : i32
    %c0_i32_0 = arith.constant 0 : i32
    return %arg0, %c0_i32 : i32, i32
  }
  func.func @transform_1(%arg0: i32) -> (i32, i32) {
    %c0_i32 = arith.constant 0 : i32
    %c0_i32_0 = arith.constant 0 : i32
    %c0_i32_1 = arith.constant 0 : i32
    return %c0_i32, %c0_i32_0 : i32, i32
  }
  func.func @transform_2(%arg0: i32) -> (i32, i32) {
    %c0_i32 = arith.constant 0 : i32
    %c0_i32_0 = arith.constant 0 : i32
    %c0_i32_1 = arith.constant 0 : i32
    return %c0_i32, %c0_i32_0 : i32, i32
  }
  func.func @transform_3(%arg0: i32) -> (i32, i32) {
    %c0_i32 = arith.constant 0 : i32
    %c0_i32_0 = arith.constant 0 : i32
    %c0_i32_1 = arith.constant 0 : i32
    return %c0_i32, %c0_i32_0 : i32, i32
  }
  func.func @transform_4(%arg0: i32) -> (i32, i32) {
    %c0_i32 = arith.constant 0 : i32
    %c0_i32_0 = arith.constant 0 : i32
    %c0_i32_1 = arith.constant 0 : i32
    return %c0_i32, %c0_i32_0 : i32, i32
  }
  func.func @transform_5(%arg0: i32) -> (i32, i32) {
    %c0_i32 = arith.constant 0 : i32
    %c0_i32_0 = arith.constant 0 : i32
    %c0_i32_1 = arith.constant 0 : i32
    return %c0_i32, %c0_i32_0 : i32, i32
  }
  func.func @transform_6(%arg0: i32) -> (i32, i32) {
    %c0_i32 = arith.constant 0 : i32
    %c0_i32_0 = arith.constant 0 : i32
    %c0_i32_1 = arith.constant 0 : i32
    return %c0_i32, %c0_i32_0 : i32, i32
  }
  func.func @transform_7(%arg0: i32) -> (i32, i32) {
    %c0_i32 = arith.constant 0 : i32
    %c0_i32_0 = arith.constant 0 : i32
    %c0_i32_1 = arith.constant 0 : i32
    return %c0_i32, %c0_i32_0 : i32, i32
  }
  func.func @transform_8(%arg0: i32) -> (i32, i32) {
    %c0_i32 = arith.constant 0 : i32
    %c0_i32_0 = arith.constant 0 : i32
    %c0_i32_1 = arith.constant 0 : i32
    return %c0_i32, %c0_i32_0 : i32, i32
  }
  func.func @transform_9(%arg0: i32) -> (i32, i32) {
    %c0_i32 = arith.constant 0 : i32
    %c0_i32_0 = arith.constant 0 : i32
    %c0_i32_1 = arith.constant 0 : i32
    return %c0_i32, %c0_i32_0 : i32, i32
  }
  func.func @transform_10(%arg0: i32) -> (i32, i32) {
    %c0_i32 = arith.constant 0 : i32
    %c0_i32_0 = arith.constant 0 : i32
    %c0_i32_1 = arith.constant 0 : i32
    return %c0_i32, %c0_i32_0 : i32, i32
  }
  func.func @transform_11(%arg0: i32) -> (i32, i32) {
    %c0_i32 = arith.constant 0 : i32
    %c0_i32_0 = arith.constant 0 : i32
    %c0_i32_1 = arith.constant 0 : i32
    return %c0_i32, %c0_i32_0 : i32, i32
  }
  func.func @transform_12(%arg0: i32) -> (i32, i32) {
    %c0_i32 = arith.constant 0 : i32
    %c0_i32_0 = arith.constant 0 : i32
    %c0_i32_1 = arith.constant 0 : i32
    return %c0_i32, %c0_i32_0 : i32, i32
  }
  func.func @transform_13(%arg0: i32) -> (i32, i32) {
    %c0_i32 = arith.constant 0 : i32
    %c0_i32_0 = arith.constant 0 : i32
    return %arg0, %c0_i32 : i32, i32
  }
}

</mosaic_0001>

<bundles_post_ra>
// kernel: tpu_custom_call.1
= control target key start
LH: loop header
LB: loop body
LE: loop exit
PB: predicated region body
PF: predicated region fallthrough
CT: control target
= control target key end

     0   :  { %s1632_s0 = inlined_call_operand.vmem [shape: f32[16,32], index: 0, kind: input, shape index: {}]   ;;  %s1633_s1 = inlined_call_operand.vmem [shape: f32[1,32], index: 1, kind: input, shape index: {}]   ;;  %s1634_s2 = inlined_call_operand.vmem [shape: f32[1,32], index: 2, kind: input, shape index: {}]   ;;  %s1635_s3 = inlined_call_operand.vmem [shape: bf16[32,96], index: 3, kind: input, shape index: {}]   ;;  %s1636_s4 = inlined_call_operand.vmem [shape: f32[1,96], index: 4, kind: input, shape index: {}]   ;;  %s1637_s5 = inlined_call_operand.vmem [shape: bf16[32,32], index: 5, kind: input, shape index: {}]   ;;  %s1638_s6 = inlined_call_operand.vmem [shape: f32[1,32], index: 6, kind: input, shape index: {}]   ;;  %s1639_s7 = inlined_call_operand.vmem [shape: f32[1,32], index: 7, kind: input, shape index: {}]   ;;  %s1640_s8 = inlined_call_operand.vmem [shape: f32[1,32], index: 8, kind: input, shape index: {}]   ;;  %s1641_s9 = inlined_call_operand.vmem [shape: bf16[32,128], index: 9, kind: input, shape index: {}]   ;;  %s1642_s10 = inlined_call_operand.vmem [shape: f32[1,128], index: 10, kind: input, shape index: {}]   ;;  %s1643_s11 = inlined_call_operand.vmem [shape: bf16[128,32], index: 11, kind: input, shape index: {}]   ;;  %s1644_s12 = inlined_call_operand.vmem [shape: f32[1,32], index: 12, kind: input, shape index: {}]   ;;  %s1645_s13 = inlined_call_operand.hbm [shape: f32[16,32], index: 13, kind: output, shape index: {}]  }
   0x1   :  { %1646 = sst [smem:[#allocation7_spill]] %s1632_s0 }
   0x2   :  { %1647 = sst [smem:[#allocation8_spill]] %s1633_s1 }
   0x3   :  { %1648 = sst [smem:[#allocation9_spill]] %s1634_s2 }
   0x4   :  { %1649 = sst [smem:[#allocation10_spill]] %s1635_s3 }
   0x5   :  { %18 = vsyncpa [#allocation5], 0 }
   0x6   :  { %20 = vsyncpa [#allocation5 + $0x1], 0  ;;  %s1420_s25 = smov 0   ;;  %s1422_s26 = smov 0  }
   0x7   :  { %s1424_s27 = smov 0   ;;  %s1426_s28 = smov 0  }
   0x8 LB: > { %s1441_s29 = sadd.s32 4294967295, %s1331_s28   ;;  %s1089_s30 = sadd.s32 4294967294, %s1331_s28   ;;  %s1331_s28 = sphi %s1426_s28, %s1659_s28   ;;  %s1327_s27 = sphi %s1424_s27, %s1658_s27   ;;  %s1323_s26 = sphi %s1422_s26, %s1657_s26   ;;  %s1319_s25 = sphi %s1420_s25, %s1656_s25  }
   0x9   : > { %s1445_s14 = sadd.s32 1, %s1331_s28   ;;  %s311_s15 = sadd.s32 1, %s1327_s27 }
   0xa   : > { %s308_s16 = ssub.s32 %s1331_s28, %s1445_s14  ;;  %p321_p0 = scmp.ne.s32.totalorder %s1327_s27, %s1323_s26 }
   0xb   : > { %p309_p1 = scmp.eq.s32.totalorder %s308_s16, 0  ;;  %p322_p2 = scmp.eq.s32.totalorder %s1441_s29, 1 }
   0xc   : > { %p327_p3 = scmp.ne.s32.totalorder %s1323_s26, %s1319_s25  ;;  %p328_p4 = scmp.eq.s32.totalorder %s1089_s30, 1 }
   0xd   : > { %s1456_s17 = scalar_select %p309_p1, %s1327_s27, %s311_s15  }
   0xe   : > { %p1458_p5 = por %p322_p2, %p321_p0  ;;  %p1462_p6 = por %p328_p4, %p327_p3 }
   0xf   : > { %p1092_p7 = scmp.ge.s32.totalorder %s1331_s28, 1  ;;  %p389_p8 = scmp.lt.s32.totalorder %s1331_s28, 3 }
  0x11   : > { %p390_p9 = pnand %p1092_p7, %p389_p8 }
  0x12   : > { %p432_p10 = scmp.lt.s32.totalorder (!%p390_p9), %s1441_s29, 1  ;;  %s1652_s0 = sld [smem:[#allocation7_spill]] (!%p390_p9) }
  0x13   : > { %393 = sbr.rel (%p390_p9) target bundleno = 2378 (0x94a), region = 72  ;;  %s1653_s3 = sld [smem:[#allocation10_spill]] (!%p390_p9) }
  0x14   : > { %s1654_s1 = sld [smem:[#allocation8_spill]] (!%p390_p9)  ;;  %s1335_s16 = smov (!%p390_p9), 88  }
  0x15   : > { %s1655_s2 = sld [smem:[#allocation9_spill]] (!%p390_p9)  ;;  %s1338_s22 = smov (!%p390_p9), 72  }
  0x16   : > { %s1339_s23 = smov (!%p390_p9), 80   ;;  %s1342_s30 = smov (!%p390_p9), 104  }
  0x17   : > { %s1343_s15 = smov (!%p390_p9), 112  }
  0x18   : > { %s433_s20 = scalar_select %p432_p10, %s1441_s29, 1  ;;  %vm440_vm0 = vcmask 261120   ;;  %v1333_v2 = vmov 32.0   ;;  %v515_v32 = vlaneseq  ;;  %v1239_v34 = vld [vmem:[%s1636_s4] ss:$0 sm:$0xff]  ;;  %v1334_v36 = vmov 1.0  }
  0x19   : > { %1245 = vrcp.f32 %v1333_v2  ;;  %v1168_v14 = vld [vmem:[%s1653_s3 + $0x8] sm:$0xff]  ;;  %v1167_v15 = vld [vmem:[%s1653_s3] sm:$0xff]  ;;  %vm521_vm6 = vcmask 781312   ;;  %vm570_vm7 = vcmask 1043456   ;;  %vm533_vm8 = vcmask 64512  }
  0x1a   : > { %s1094_s21 = sshll.u32 %s433_s20, 3  ;;  %508 = vmatpush.bf16.msra.mxu0 %v1168_v14  ;;  %v1237_v25 = vld [vmem:[%s1654_s1] ss:$0 sm:$0xff]  ;;  %v516_v33 = vand.u32 127, %v515_v32  ;;  %s1336_s20 = smov 64   ;;  %v524_v55 = vshrl.u32 %v515_v32, 7 }
  0x1b   : > { %s435_s24 = scalar_lea.vmem %s1652_s0, %s1094_s21  ;;  %v1238_v28 = vld [vmem:[%s1655_s2] ss:$0 sm:$0xff]  ;;  %s1337_s21 = smov 96   ;;  %v1340_v56 = vmov 0.0   ;;  %vm588_vm10 = vcmask 60416   ;;  %vm651_vm11 = vcmask 126016  }
  0x1c   : > { %v1473_v0 = vld [vmem:[%s435_s24] sm:$0xff]  ;;  %vm517_vm5 = vcmp.lt.s32.totalorder %v516_v33, 32  ;;  %vm525_vm9 = vcmp.gt.s32.totalorder %v516_v33, %v524_v55  ;;  %s1341_s24 = smov 120   ;;  %vm714_vm12 = vcmask 191616   ;;  %vm777_vm13 = vcmask 257216  }
  0x1d   : > { %v441_v1 = vsel %vm440_vm0, %v1473_v0, 0.0  ;;  %v518_v37 = vsel %vm517_vm5, 0.35355338, %v1334_v36  ;;  %v526_v57 = vsel %vm525_vm9, -10000.0, %v1340_v56 }
  0x1e   : > { %442 = vadd.xlane.f32.xlu0 %v441_v1  ;;  %509 = vmatpush.bf16.msra.mxu0 %v1167_v15 }
  0x1f   : > { %v1246_v3 = vpop.eup %1245 }
  0x20   : > { %v445_v4 = vmul.f32 32.0, %v1246_v3  ;;  %vm449_vm1 = vweird.f32 %v1246_v3 }
  0x22   : > { %v446_v5 = vsub.f32 1.0, %v445_v4 }
  0x24   : > { %v447_v6 = vmul.f32 %v1246_v3, %v446_v5 }
  0x26   : > { %v448_v7 = vadd.f32 %v1246_v3, %v447_v6 }
  0x28   : > { %v1477_v8 = vsel %vm449_vm1, %v1246_v3, %v448_v7 }
  0x91   : > { %v443_v9 = vpop.xlane.xlu0 %442 }
  0x92   : > { %v451_v10 = vmul.f32 %v1477_v8, %v443_v9 }
  0x94   : > { %v452_v11 = vsub.f32 %v1473_v0, %v451_v10 }
  0x96   : > { %v453_v12 = vmul.f32 %v452_v11, %v452_v11 }
  0x98   : > { %v454_v13 = vsel %vm440_vm0, %v453_v12, 0.0 }
  0x99   : > { %455 = vadd.xlane.f32.xlu0 %v454_v13 }
 0x10c   : > { %v456_v16 = vpop.xlane.xlu0 %455 }
 0x10d   : > { %v457_v17 = vmul.f32 %v456_v16, %v1477_v8 }
 0x10f   : > { %v458_v18 = vadd.f32 1e-05, %v457_v17 }
 0x111   : > { %1247 = vrsqrt.f32 %v458_v18  ;;  %vm465_vm3 = vweird.f32 %v458_v18 }
 0x117   : > { %v1248_v19 = vpop.eup %1247 }
 0x118   : > { %v460_v20 = vmul.f32 %v1248_v19, %v458_v18  ;;  %vm466_vm2 = vweird.f32 %v1248_v19 }
 0x119   : > { %vm467_vm4 = vmor %vm465_vm3, %vm466_vm2 }
 0x11a   : > { %v461_v21 = vmul.f32 %v1248_v19, %v460_v20 }
 0x11c   : > { %v462_v22 = vmul.f32 0.5, %v461_v21 }
 0x11e   : > { %v463_v23 = vsub.f32 1.5, %v462_v22 }
 0x120   : > { %v464_v24 = vmul.f32 %v1248_v19, %v463_v23 }
 0x122   : > { %v468_v26 = vsel %vm467_vm4, %v1248_v19, %v464_v24 }
 0x123   : > { %v469_v27 = vmul.f32 %v468_v26, %v452_v11 }
 0x125   : > { %v473_v29 = vmul.f32 %v1237_v25, %v469_v27 }
 0x127   : > { %v477_v30 = vadd.f32 %v1238_v28, %v473_v29 }
 0x129   : > { %v478_v31 = vpack.c.bf16 %v477_v30, %v477_v30 }
 0x12b   : > { %1103 = vmatmul.msk.bf16.vlgmr.msra.gmra.mxu0 %vm440_vm0, %v478_v31 }
 0x1a8   : > { %v511_v35 = vpop.f32.mrf.mxu0 }
 0x1a9   : > { %v512_v38 = vadd.f32 %v1239_v34, %v511_v35 }
 0x1ab   : > { %v519_v39 = vmul.f32 %v518_v37, %v512_v38 }
 0x1ad   : > { %v520_v40 = vpack.c.bf16 %v519_v39, %v519_v39 }
 0x1af   : > { %522 = vst.msk [vmem:[#allocation2] sm:$0xf] %vm521_vm6, %v520_v40 }
 0x1b0   : > { %v513_v41 = vpop.f32.mrf.mxu0 }
 0x1b6   : > { %v527_v42 = vld [vmem:[#allocation2] sm:$0xf] }
 0x1b7   : > { %v529_v43 = vunpack.c.l.b16 %v527_v42 }
 0x1b9   : > { %v1499_v44 = vpack.c.b16 %v529_v43, %v529_v43 }
 0x1bb   : > { %592 = vrot.lane.b32.xlu0 %v1499_v44, %s1335_s16  ;;  %565 = vrot.lane.b32.xlu2 %v1499_v44, %s1336_s20  ;;  %s1344_s16 = smov 40   ;;  %s1345_s20 = smov 48  }
 0x1bc   : > { %531 = vrot.lane.b32.xlu1 %v1499_v44, %s1337_s21  ;;  %s1346_s21 = smov 56  }
 0x1c3   : > { %718 = vrot.lane.b32.xlu0 %v1499_v44, %s1338_s22  ;;  %s1347_s22 = smov 16  }
 0x1cb   : > { %655 = vrot.lane.b32.xlu0 %v1499_v44, %s1339_s23  ;;  %s1348_s23 = smov 8  }
 0x215   : > { %v566_v45 = vpop.permute.xlu2 %565 }
 0x216   : > { %v572_v46 = vsel %vm570_vm7, %v566_v45, 0 }
 0x217   : > { %581 = vmatpush.bf16.msra.mxu2 %v572_v46 }
 0x22d   : > { %v593_v47 = vpop.permute.xlu0 %592 }
 0x22e   : > { %v532_v48 = vpop.permute.xlu1 %531  ;;  %v598_v49 = vsel %vm533_vm8, %v593_v47, 0 }
 0x22f   : > { %v538_v50 = vsel %vm533_vm8, %v532_v48, 0  ;;  %607 = vmatpush.bf16.xpose.msrb.mxu2 %v598_v49 }
 0x230   : > { %547 = vmatpush.bf16.xpose.msra.mxu1 %v538_v50 }
 0x235   : > { %v719_v51 = vpop.permute.xlu0 %718 }
 0x236   : > { %v724_v52 = vsel %vm533_vm8, %v719_v51, 0 }
 0x237   : > { %1104 = vmatmul.msk.bf16.vlgmr.msra.gmra.mxu1 %vm533_vm8, %v527_v42  ;;  %733 = vmatpush.bf16.xpose.msra.mxu3 %v724_v52 }
 0x23d   : > { %v656_v53 = vpop.permute.xlu0 %655 }
 0x23e   : > { %v661_v54 = vsel %vm533_vm8, %v656_v53, 0 }
 0x23f   : > { %670 = vmatpush.bf16.xpose.msrb.mxu0 %v661_v54 }
 0x2b4   : > { %v549_v58 = vpop.f32.mrf.mxu1 }
 0x2b5   : > { %v550_v59 = vadd.f32 %v549_v58, %v526_v57 }
 0x2b7   : > { %v553_v60 = vsel %vm533_vm8, %v550_v59, -inf }
 0x2b8   : > { %554 = vmax.xlane.f32.xlu1 %v553_v60 }
 0x2bc   : > { %v551_v61 = vpop.f32.mrf.mxu1 }
 0x32b   : > { %v555_v62 = vpop.xlane.xlu1 %554 }
 0x32c   : > { %v556_v63 = vsub.f32 %v550_v59, %v555_v62 }
 0x32e   : > { %v557_v1 = vmul.f32 1.442695, %v556_v63 }
 0x330   : > { %1249 = vpow2.f32 %v557_v1 }
 0x336   : > { %v1250_v2 = vpop.eup %1249 }
 0x337   : > { %v559_v3 = vsel %vm533_vm8, %v1250_v2, 0.0 }
 0x338   : > { %560 = vadd.xlane.f32.xlu2 %v559_v3 }
 0x350   : > { %590 = vrot.lane.b32.xlu2 %v1499_v44, %s1341_s24  ;;  %s1349_s24 = smov 24  }
 0x358   : > { %716 = vrot.lane.b32.xlu2 %v1499_v44, %s1342_s30  ;;  %s429_s30 = sand.u32 1, %s1323_s26  }
 0x360   : > { %653 = vrot.lane.b32.xlu2 %v1499_v44, %s1343_s15  ;;  %s1093_s15 = sshll.u32 %s429_s30, 3 }
 0x361   : > { %s431_s0 = scalar_lea.vmem [#allocation4], %s1093_s15  ;;  %s1289_s15 = scalar_lea.hbm %s1645_s13, 16 }
 0x362   : > { %s1027_s1 = sshll.u32 %s431_s0, 4  ;;  %s1028_s1 = int_to_ptr.vmem [resolvable:$true] %s1027_s1 }
 0x3ab   : > { %v561_v4 = vpop.xlane.xlu2 %560 }
 0x3ac   : > { %1251 = vrcp.f32 %v561_v4 }
 0x3b2   : > { %v1252_v5 = vpop.eup %1251 }
 0x3b3   : > { %v591_v6 = vpop.permute.xlu2 %590  ;;  %v563_v7 = vmul.f32 %v1252_v5, %v1250_v2 }
 0x3b5   : > { %v564_v9 = vpack.c.bf16 %v563_v7, %v563_v7 }
 0x3b7   : > { %1105 = vmatmul.msk.bf16.vlgmr.msra.gmra.mxu2 %vm533_vm8, %v564_v9 }
 0x3bb   : > { %v717_v10 = vpop.permute.xlu2 %716 }
 0x3bc   : > { %1110 = vmatmul.msk.bf16.vlgmr.msra.gmra.mxu3 %vm533_vm8, %v717_v10  ;;  %v1169_v10 = vld [vmem:[%s1637_s5] sm:$0xff] }
 0x3c3   : > { %v654_v11 = vpop.permute.xlu2 %653 }
 0x3c4   : > { %1108 = vmatmul.msk.bf16.vlgmr.msrb.gmra.mxu0 %vm533_vm8, %v654_v11 }
 0x3c7   : > { %1106 = vmatmul.msk.bf16.vlgmr.msrb.gmra.mxu2 %vm533_vm8, %v591_v6  ;;  %v1170_v6 = vld [vmem:[%s1637_s5 + $0x8] sm:$0xff] }
 0x3c8   : > { %809 = vmatpush.bf16.msra.mxu0 %v1170_v6 }
 0x3cc   : > { %810 = vmatpush.bf16.msra.mxu0 %v1169_v10 }
 0x43a   : > { %v583_v12 = vpop.f32.mrf.mxu2 }
 0x43b   : > { %v587_v13 = vpack.c.bf16 %v583_v12, %v583_v12 }
 0x43d   : > { %589 = vst.msk [vmem:[#allocation3] sm:$0xf] %vm588_vm10, %v587_v13  ;;  %v1240_v13 = vld [vmem:[%s1638_s6] ss:$0 sm:$0xff] }
 0x43f   : > { %v735_v14 = vpop.f32.mrf.mxu3 }
 0x440   : > { %v736_v15 = vadd.f32 %v735_v14, %v526_v57 }
 0x441   : > { %v672_v16 = vpop.f32.mrf.mxu0 }
 0x442   : > { %v673_v17 = vadd.f32 %v672_v16, %v526_v57  ;;  %v585_v18 = vpop.f32.mrf.mxu2  ;;  %v739_v19 = vsel %vm533_vm8, %v736_v15, -inf }
 0x443   : > { %740 = vmax.xlane.f32.xlu0 %v739_v19 }
 0x444   : > { %v676_v20 = vsel %vm533_vm8, %v673_v17, -inf }
 0x445   : > { %677 = vmax.xlane.f32.xlu2 %v676_v20 }
 0x447   : > { %v737_v21 = vpop.f32.mrf.mxu3 }
 0x449   : > { %v674_v22 = vpop.f32.mrf.mxu0 }
 0x44a   : > { %v609_v23 = vpop.f32.mrf.mxu2 }
 0x44b   : > { %v610_v24 = vadd.f32 %v609_v23, %v526_v57 }
 0x44d   : > { %v613_v25 = vsel %vm533_vm8, %v610_v24, -inf }
 0x44e   : > { %614 = vmax.xlane.f32.xlu1 %v613_v25 }
 0x452   : > { %v611_v26 = vpop.f32.mrf.mxu2 }
 0x45d   : > { %751 = vrot.lane.b32.xlu2 %v1499_v44, %s1344_s16  ;;  %s1164_s16 = sshll.u32 %s1441_s29, 3  ;;  %s1015_s29 = scalar_lea.sflag [#allocation5], %s429_s30 }
 0x4b6   : > { %v741_v37 = vpop.xlane.xlu0 %740 }
 0x4b7   : > { %v742_v38 = vsub.f32 %v736_v15, %v741_v37 }
 0x4b8   : > { %v678_v27 = vpop.xlane.xlu2 %677 }
 0x4b9   : > { %v679_v28 = vsub.f32 %v673_v17, %v678_v27  ;;  %v743_v39 = vmul.f32 1.442695, %v742_v38 }
 0x4bb   : > { %v680_v29 = vmul.f32 1.442695, %v679_v28 }
 0x4bd   : > { %1253 = vpow2.f32 %v680_v29 }
 0x4c0   : > { %v752_v50 = vpop.permute.xlu2 %751 }
 0x4c1   : > { %v615_v30 = vpop.xlane.xlu1 %614  ;;  %v757_v54 = vsel %vm570_vm7, %v752_v50, 0 }
 0x4c2   : > { %v616_v31 = vsub.f32 %v610_v24, %v615_v30  ;;  %v1172_v24 = vld [vmem:[%s1641_s9 + $0x8] sm:$0xff] }
 0x4c3   : > { %v1254_v32 = vpop.eup %1253 }
 0x4c4   : > { %v617_v33 = vmul.f32 1.442695, %v616_v31  ;;  %v682_v34 = vsel %vm533_vm8, %v1254_v32, 0.0 }
 0x4c5   : > { %683 = vadd.xlane.f32.xlu0 %v682_v34  ;;  %v1241_v34 = vld [vmem:[%s1639_s7] ss:$0 sm:$0xff] }
 0x4c6   : > { %1255 = vpow2.f32 %v617_v33 }
 0x4c7   : > { %1257 = vpow2.f32 %v743_v39 }
 0x4cc   : > { %v1256_v35 = vpop.eup %1255 }
 0x4cd   : > { %v619_v36 = vsel %vm533_vm8, %v1256_v35, 0.0  ;;  %v1258_v40 = vpop.eup %1257 }
 0x4ce   : > { %620 = vadd.xlane.f32.xlu1 %v619_v36  ;;  %v745_v41 = vsel %vm533_vm8, %v1258_v40, 0.0 }
 0x4d9   : > { %688 = vrot.lane.b32.xlu0 %v1499_v44, %s1345_s20 }
 0x4e7   : > { %625 = vrot.lane.b32.xlu1 %v1499_v44, %s1346_s21 }
 0x511   : > { %746 = vadd.xlane.f32.xlu1 %v745_v41  ;;  %v1179_v41 = vld [vmem:[%s1643_s11 + $0x30] sm:$0xff] }
 0x538   : > { %v684_v42 = vpop.xlane.xlu0 %683 }
 0x539   : > { %1259 = vrcp.f32 %v684_v42  ;;  %v1243_v42 = vld [vmem:[%s1642_s10] ss:$0 sm:$0xff] }
 0x53f   : > { %v1260_v43 = vpop.eup %1259 }
 0x540   : > { %v686_v45 = vmul.f32 %v1260_v43, %v1254_v32 }
 0x541   : > { %v621_v47 = vpop.xlane.xlu1 %620 }
 0x542   : > { %v687_v49 = vpack.c.bf16 %v686_v45, %v686_v45  ;;  %1261 = vrcp.f32 %v621_v47  ;;  %v1178_v45 = vld [vmem:[%s1643_s11 + $0x28] sm:$0xff] }
 0x548   : > { %v1262_v44 = vpop.eup %1261 }
 0x549   : > { %v623_v51 = vmul.f32 %v1262_v44, %v1256_v35 }
 0x54b   : > { %v689_v46 = vpop.permute.xlu0 %688  ;;  %v624_v55 = vpack.c.bf16 %v623_v51, %v623_v51  ;;  %v1176_v51 = vld [vmem:[%s1643_s11 + $0x18] sm:$0xff] }
 0x54c   : > { %v694_v48 = vsel %vm570_vm7, %v689_v46, 0 }
 0x54d   : > { %703 = vmatpush.bf16.msrb.mxu1 %v694_v48  ;;  %v1177_v48 = vld [vmem:[%s1643_s11 + $0x20] sm:$0xff] }
 0x550   : > { %1109 = vmatmul.msk.bf16.vlgmr.msrb.gmra.mxu1 %vm533_vm8, %v687_v49 }
 0x551   : > { %879 = vmatpush.bf16.msra.mxu1 %v1172_v24 }
 0x559   : > { %v626_v52 = vpop.permute.xlu1 %625 }
 0x55a   : > { %v631_v53 = vsel %vm570_vm7, %v626_v52, 0 }
 0x55b   : > { %640 = vmatpush.bf16.msra.mxu2 %v631_v53 }
 0x55e   : > { %1107 = vmatmul.msk.bf16.vlgmr.msra.gmra.mxu2 %vm533_vm8, %v624_v55 }
 0x55f   : > { %766 = vmatpush.bf16.msrb.mxu2 %v757_v54 }
 0x584   : > { %v747_v56 = vpop.xlane.xlu1 %746 }
 0x585   : > { %1263 = vrcp.f32 %v747_v56  ;;  %v1175_v56 = vld [vmem:[%s1643_s11 + $0x10] sm:$0xff] }
 0x58b   : > { %v1264_v57 = vpop.eup %1263 }
 0x58c   : > { %v749_v58 = vmul.f32 %v1264_v57, %v1258_v40  ;;  %v1180_v40 = vld [vmem:[%s1643_s11 + $0x38] sm:$0xff] }
 0x58d   : > { %999 = vmatpush.bf16.msrb.mxu3 %v1180_v40 }
 0x58e   : > { %v750_v59 = vpack.c.bf16 %v749_v58, %v749_v58 }
 0x590   : > { %1111 = vmatmul.msk.bf16.vlgmr.msrb.gmra.mxu2 %vm533_vm8, %v750_v59  ;;  %v1174_v59 = vld [vmem:[%s1643_s11 + $0x8] sm:$0xff] }
 0x591   : > { %1000 = vmatpush.bf16.msrb.mxu3 %v1179_v41 }
 0x595   : > { %1001 = vmatpush.bf16.msrb.mxu3 %v1178_v45 }
 0x599   : > { %1002 = vmatpush.bf16.msrb.mxu3 %v1177_v48 }
 0x59d   : > { %1003 = vmatpush.bf16.msrb.mxu3 %v1176_v51 }
 0x5a1   : > { %1004 = vmatpush.bf16.msrb.mxu3 %v1175_v56 }
 0x5a5   : > { %1005 = vmatpush.bf16.msrb.mxu3 %v1174_v59 }
 0x5cd   : > { %v705_v60 = vpop.f32.mrf.mxu1 }
 0x5ce   : > { %v709_v61 = vpack.c.bf16 %v705_v60, %v705_v60 }
 0x5d0   : > { %711 = vrot.lane.b32.xlu0 %v709_v61, %s1347_s22 }
 0x5d5   : > { %v707_v62 = vpop.f32.mrf.mxu1 }
 0x5e1   : > { %v642_v63 = vpop.f32.mrf.mxu2 }
 0x5e2   : > { %v646_v1 = vpack.c.bf16 %v642_v63, %v642_v63  ;;  %v1173_v63 = vld [vmem:[%s1643_s11] sm:$0xff] }
 0x5e3   : > { %1006 = vmatpush.bf16.msrb.mxu3 %v1173_v63 }
 0x5e4   : > { %648 = vrot.lane.b32.xlu2 %v646_v1, %s1348_s23 }
 0x5e9   : > { %v644_v2 = vpop.f32.mrf.mxu2 }
 0x613   : > { %v768_v3 = vpop.f32.mrf.mxu2 }
 0x614   : > { %v772_v4 = vpack.c.bf16 %v768_v3, %v768_v3 }
 0x616   : > { %774 = vrot.lane.b32.xlu2 %v772_v4, %s1349_s24  ;;  %s1025_s24 = scalar_lea.hbm %s1645_s13, %s1164_s16 }
 0x617   : > { %s1029_s2 = sshll.u32 %s1025_s24, 4  ;;  %s1030_s2 = int_to_ptr.hbm [resolvable:$true] %s1029_s2 }
 0x618   : > { %s1283_s3 = sshra.s32 %s1030_s2, 4  ;;  %s1284_s3 = int_to_ptr.hbm [resolvable:$true] %s1283_s3 }
 0x619   : > { %s1285_s20 = scalar_lea.hbm %s1284_s3, 8  ;;  %p1290_p0 = scmp.lt.s32.totalorder %s1284_s3, %s1645_s13 }
 0x61a   : > { %p1286_p11 = scmp.ne.s32.totalorder %s1284_s3, %s1285_s20  ;;  %p1291_p1 = scmp.lt.s32.totalorder %s1289_s15, %s1285_s20 }
 0x61b   : > { %v770_v5 = vpop.f32.mrf.mxu2 }
 0x61c   : > { %p1287_p12 = pnand %p1286_p11, %p1458_p5  ;;  %p1292_p2 = por %p1291_p1, %p1290_p0 }
 0x61e   : > { %p1288_p13 = pneg %p1287_p12 }
 0x620   : > { %p1293_p3 = pnand %p1292_p2, %p1288_p13 }
 0x63e   : > { %v649_v7 = vpop.permute.xlu2 %648 }
 0x63f   : > { %652 = vst.msk [vmem:[#allocation3] sm:$0xf] %vm651_vm11, %v649_v7 }
 0x642   : > { %v712_v9 = vpop.permute.xlu0 %711 }
 0x643   : > { %715 = vst.msk [vmem:[#allocation3] sm:$0xf] %vm714_vm12, %v712_v9 }
 0x670   : > { %v775_v11 = vpop.permute.xlu2 %774 }
 0x671   : > { %778 = vst.msk [vmem:[#allocation3] sm:$0xf] %vm777_vm13, %v775_v11 }
 0x678   : > { %v779_v12 = vld [vmem:[#allocation3] sm:$0xf] }
 0x679   : > { %1120 = vmatmul.msk.bf16.vlgmr.msra.gmra.mxu0 %vm440_vm0, %v779_v12 }
 0x6f6   : > { %v812_v14 = vpop.f32.mrf.mxu0 }
 0x6f7   : > { %v813_v15 = vadd.f32 %v1240_v13, %v812_v14 }
 0x6f9   : > { %v1547_v16 = vadd.f32 %v813_v15, %v1473_v0  ;;  %v1171_v0 = vld [vmem:[%s1641_s9] sm:$0xff] }
 0x6fa   : > { %880 = vmatpush.bf16.msra.mxu1 %v1171_v0 }
 0x6fb   : > { %v819_v17 = vsel %vm440_vm0, %v1547_v16, 0.0 }
 0x6fc   : > { %820 = vadd.xlane.f32.xlu0 %v819_v17 }
 0x6fe   : > { %v814_v18 = vpop.f32.mrf.mxu0 }
 0x76f   : > { %v821_v19 = vpop.xlane.xlu0 %820 }
 0x770   : > { %v822_v20 = vmul.f32 %v821_v19, %v1477_v8 }
 0x772   : > { %v823_v21 = vsub.f32 %v1547_v16, %v822_v20 }
 0x774   : > { %v824_v22 = vmul.f32 %v823_v21, %v823_v21 }
 0x776   : > { %v825_v23 = vsel %vm440_vm0, %v824_v22, 0.0 }
 0x777   : > { %826 = vadd.xlane.f32.xlu1 %v825_v23 }
 0x7ea   : > { %v827_v25 = vpop.xlane.xlu1 %826 }
 0x7eb   : > { %v828_v26 = vmul.f32 %v827_v25, %v1477_v8  ;;  %v1242_v8 = vld [vmem:[%s1640_s8] ss:$0 sm:$0xff] }
 0x7ed   : > { %v829_v27 = vadd.f32 1e-05, %v828_v26 }
 0x7ef   : > { %1265 = vrsqrt.f32 %v829_v27  ;;  %vm836_vm15 = vweird.f32 %v829_v27 }
 0x7f5   : > { %v1266_v28 = vpop.eup %1265 }
 0x7f6   : > { %v831_v29 = vmul.f32 %v1266_v28, %v829_v27  ;;  %vm837_vm14 = vweird.f32 %v1266_v28 }
 0x7f7   : > { %vm838_vm1 = vmor %vm836_vm15, %vm837_vm14 }
 0x7f8   : > { %v832_v30 = vmul.f32 %v1266_v28, %v831_v29 }
 0x7fa   : > { %v833_v31 = vmul.f32 0.5, %v832_v30  ;;  %v1244_v30 = vld [vmem:[%s1644_s12] ss:$0 sm:$0xff] }
 0x7fc   : > { %v834_v32 = vsub.f32 1.5, %v833_v31 }
 0x7fe   : > { %v835_v33 = vmul.f32 %v1266_v28, %v834_v32 }
 0x800   : > { %v839_v35 = vsel %vm838_vm1, %v1266_v28, %v835_v33 }
 0x801   : > { %v840_v36 = vmul.f32 %v839_v35, %v823_v21 }
 0x803   : > { %v844_v37 = vmul.f32 %v1241_v34, %v840_v36 }
 0x805   : > { %v848_v38 = vadd.f32 %v1242_v8, %v844_v37 }
 0x807   : > { %v849_v39 = vpack.c.bf16 %v848_v38, %v848_v38 }
 0x809   : > { %1129 = vmatmul.msk.bf16.vlgmr.msra.gmra.mxu1 %vm440_vm0, %v849_v39 }
 0x886   : > { %v882_v43 = vpop.f32.mrf.mxu1 }
 0x887   : > { %v883_v46 = vadd.f32 %v1243_v42, %v882_v43 }
 0x889   : > { %v887_v47 = vmul.f32 0.70710677, %v883_v46  ;;  %v886_v26 = vmul.f32 0.5, %v883_v46 }
 0x88b   : > { %v888_v49 = vmul.f32 %v887_v47, %v887_v47 }
 0x88d   : > { %v889_v44 = vmin.f32 %v888_v49, 16.0 }
 0x88e   : > { %v884_v50 = vpop.f32.mrf.mxu1 }
 0x88f   : > { %v890_v52 = vmul.f32 2.1237322e-06, %v889_v44  ;;  %v901_v53 = vmul.f32 3.8918573e-05, %v889_v44 }
 0x891   : > { %v891_v54 = vadd.f32 0.00028619796, %v890_v52  ;;  %v902_v55 = vadd.f32 0.001143296, %v901_v53 }
 0x893   : > { %v892_v57 = vmul.f32 %v891_v54, %v889_v44  ;;  %v903_v58 = vmul.f32 %v902_v55, %v889_v44 }
 0x895   : > { %v904_v60 = vadd.f32 0.014752088, %v903_v58  ;;  %v893_v61 = vadd.f32 0.0036580483, %v892_v57 }
 0x897   : > { %v905_v62 = vmul.f32 %v904_v60, %v889_v44  ;;  %v894_v2 = vmul.f32 %v893_v61, %v889_v44 }
 0x899   : > { %v906_v1 = vadd.f32 0.112945676, %v905_v62  ;;  %v895_v5 = vadd.f32 0.05243302, %v894_v2 }
 0x89b   : > { %v907_v3 = vmul.f32 %v906_v1, %v889_v44  ;;  %v896_v9 = vmul.f32 %v895_v5, %v889_v44 }
 0x89d   : > { %v908_v4 = vadd.f32 0.4994258, %v907_v3  ;;  %v897_v10 = vadd.f32 0.18741608, %v896_v9 }
 0x89f   : > { %v909_v6 = vmul.f32 %v908_v4, %v889_v44  ;;  %v898_v12 = vmul.f32 %v897_v10, %v889_v44 }
 0x8a1   : > { %v910_v7 = vadd.f32 1.0, %v909_v6  ;;  %v899_v17 = vadd.f32 1.1283791, %v898_v12 }
 0x8a3   : > { %1267 = vrcp.f32 %v910_v7  ;;  %v922_v15 = vand.u32 2147483648, %v910_v7  ;;  %v920_v19 = vand.u32 2147483647, %v910_v7  ;;  %vm916_vm3 = vweird.f32 %v910_v7 }
 0x8a4   : > { %v900_v22 = vmul.f32 %v899_v17, %v887_v47 }
 0x8a5   : > { %v923_v21 = vor.u32 1.1754944e-38, %v922_v15  ;;  %vm921_vm5 = vcmp.eq.f32.partialorder %v920_v19, 8.507059e+37 }
 0x8a9   : > { %v1268_v11 = vpop.eup %1267 }
 0x8aa   : > { %v912_v13 = vmul.f32 %v1268_v11, %v910_v7  ;;  %vm917_vm2 = vweird.f32 %v1268_v11 }
 0x8ab   : > { %vm918_vm4 = vmor %vm916_vm3, %vm917_vm2 }
 0x8ac   : > { %v913_v14 = vsub.f32 1.0, %v912_v13 }
 0x8ae   : > { %v914_v18 = vmul.f32 %v1268_v11, %v913_v14 }
 0x8b0   : > { %v915_v20 = vadd.f32 %v1268_v11, %v914_v18 }
 0x8b2   : > { %v919_v23 = vsel %vm918_vm4, %v1268_v11, %v915_v20 }
 0x8b3   : > { %v924_v24 = vsel %vm921_vm5, %v923_v21, %v919_v23 }
 0x8b4   : > { %v925_v0 = vmul.f32 %v924_v24, %v900_v22 }
 0x8b6   : > { %v1130_v25 = vclamps-f32 %v925_v0, 1.0 }
 0x8b8   : > { %v928_v27 = vadd.f32 1.0, %v1130_v25 }
 0x8ba   : > { %v929_v28 = vmul.f32 %v928_v27, %v886_v26 }
 0x8bc   : > { %v930_v29 = vpack.c.bf16 %v929_v28, %v929_v28 }
 0x8be   : > { %1007 = vmatmul.bf16.vlgmr.msrb.gmra.mxu3 %v930_v29 }
 0x941   : > { %v1008_v31 = vpop.f32.mrf.mxu3 }
 0x942   : > { %v1009_v32 = vadd.f32 %v1244_v30, %v1008_v31 }
 0x944   : > { %v1012_v33 = vadd.f32 %v1009_v32, %v1547_v16 }
 0x946   : > { %1013 = vst.msk [vmem:[%s431_s0] sm:$0xff] %vm440_vm0, %v1012_v33 }
 0x947   : > { %1296 = shalt.err (!%p1293_p3)
}
 0x948   : > { %1181 = dma.vmem_to_hbm [thread:$0]  (%p1458_p5), %s1028_s1, 128, %s1030_s2, %s1015_s29  }
 0x949   : > { %v1010_v16 = vpop.f32.mrf.mxu3 }
 0x94a PF: > { %p1187_p4 = scmp.ge.s32.totalorder %s1331_s28, 2  ;;  %s1041_s0 = sand.u32 1, %s1319_s25  }
 0x94b   : > { %s1042_s30 = scalar_lea.sflag [#allocation5], %s1041_s0 }
 0x94c   : > { %p1184_p7 = pnand %p1187_p4, %p1462_p6 }
 0x94e   : > { %p1185_p8 = pneg %p1184_p7 }
 0x950   : > { %1314 = dma.done.wait (%p1185_p8), %s1042_s30, 128  }
 0x951   : > { %1316 = vsyncadd (%p1185_p8), %s1042_s30, 4294967168  ;;  %p23_p9 = scmp.ge.s32.totalorder %s1445_s14, 4   ;;  %s1656_s25 = smov %s1323_s26 }
 0x952   : > { %s1657_s26 = smov %s1327_s27  ;;  %s1658_s27 = smov %s1456_s17 }
 0x953   : > { %s1659_s28 = smov %s1445_s14  ;;  %25 = sbr.rel (!%p23_p9) target bundleno = 8 (0x8), region = 107 }
 0x958   :  { %1048 = vsyncpa [#allocation5], 1 }
 0x959   :  { %1050 = vsyncpa [#allocation5 + $0x1], 1 }

</bundles_post_ra>
